<compile_context>
chip_gen: v5e
topology: v5e:2x2
jax: 0.10.0
libtpu: 0.0.40
codegen_flags: <defaults>
</compile_context>

<pallas_src>
import functools
import math

import jax
import jax.numpy as jnp
from jax import lax
from jax.experimental import pallas as pl
from jax.experimental.pallas import tpu as pltpu

_STAT_WIDTH = 128  # lane-dense width for the m/l online-softmax statistics


def _round_up(n, m):
    return ((n + m - 1) // m) * m


def _pick_block_n(d_pad):
    # Output-column tile for the projection; d_pad is always a multiple of 128.
    for cand in (512, 256, 128):
        if d_pad % cand == 0:
            return cand
    return 128


# ---------------------------------------------------------------------------
# Kernel 1: fused QKV projection   qkv = x @ [Wq | Wk | Wv]   (lane-dense, bf16 MXU)
# ---------------------------------------------------------------------------
def _qkv_proj_kernel(x_ref, w_ref, qkv_ref):
    qkv_ref[...] = jnp.dot(
        x_ref[...].astype(w_ref.dtype),  # cast to compute dtype in-kernel (bf16 MXU path)
        w_ref[...],
        preferred_element_type=jnp.float32,
    ).astype(qkv_ref.dtype)


# ---------------------------------------------------------------------------
# Kernel 2: flash-style attention with online softmax (no full score matrix)
# ---------------------------------------------------------------------------
def _flash_attn_kernel(q_ref, k_ref, v_ref, o_ref, m_ref, l_ref, acc_ref, *,
                       seq_len, seq_pad, scale):
    ki = pl.program_id(1)

    @pl.when(ki == 0)
    def _init():
        m_ref[...] = jnp.full_like(m_ref, -1e30)
        l_ref[...] = jnp.zeros_like(l_ref)
        acc_ref[...] = jnp.zeros_like(acc_ref)

    # Scale Q (touches block_q*d elements) instead of the (block_q, block_kv) score tile.
    q = q_ref[...] * scale

    # QK^T without materializing keys.T: contract dim 1 of both operands on the MXU.
    s = lax.dot_general(
        q, k_ref[...],
        dimension_numbers=(((1,), (1,)), ((), ())),
        preferred_element_type=jnp.float32,
    )  # (block_q, block_kv) f32

    if seq_len != seq_pad:  # static check: mask padded KV columns only when padding exists
        bk = k_ref.shape[0]
        kv_pos = ki * bk + lax.broadcasted_iota(jnp.int32, s.shape, 1)
        s = jnp.where(kv_pos < seq_len, s, -1e30)

    m_prev = m_ref[:, :1]  # (block_q, 1) view of the lane-dense scratch
    l_prev = l_ref[:, :1]
    m_new = jnp.maximum(m_prev, jnp.max(s, axis=-1, keepdims=True))
    alpha = jnp.exp(m_prev - m_new)
    p = jnp.exp(s - m_new)
    l_new = alpha * l_prev + jnp.sum(p, axis=-1, keepdims=True)
    acc_ref[...] = alpha * acc_ref[...] + jnp.dot(
        p.astype(v_ref.dtype), v_ref[...], preferred_element_type=jnp.float32
    )
    # Lane-dense stores: no masked (x,1) partial stores in the kv loop.
    m_ref[...] = jnp.broadcast_to(m_new, m_ref.shape)
    l_ref[...] = jnp.broadcast_to(l_new, l_ref.shape)

    @pl.when(ki == pl.num_programs(1) - 1)
    def _finalize():
        # Exact reciprocal (runs once per q tile): keeps the f32 path at ~1e-6 of reference.
        o_ref[...] = (acc_ref[...] / l_ref[:, :1]).astype(o_ref.dtype)


# ---------------------------------------------------------------------------
# Forward: padding / layout plumbing + two pallas_calls
# ---------------------------------------------------------------------------
@functools.partial(jax.jit, static_argnames=("d_out", "block_q", "block_kv"))
def _self_attention_fwd(x, w_qkv, *, d_out, block_q, block_kv):
    """x: (T, d_in); w_qkv: (d_in, 3*d_pad) pre-padded/concatenated weights."""
    T, d_in = x.shape
    d_pad = w_qkv.shape[1] // 3
    cdt = w_qkv.dtype                      # compute dtype for MXU operands (bf16 default)
    out_dtype = x.dtype
    scale = 1.0 / float(d_out) ** 0.5      # uses the *true* d_out, matching the reference

    # Clamp tiles for short sequences so small inputs need no sequence padding at all.
    t8 = _round_up(T, 8)
    bq = min(block_q, t8)
    bkv = min(block_kv, t8)
    t_pad = _round_up(T, (bq * bkv) // math.gcd(bq, bkv))  # == bq == bkv with defaults

    # Zero padding is exact: zero Q/K rows contribute nothing and padded KV columns are
    # masked in-kernel; only taken when T is not already a tile multiple.
    x_p = x if t_pad == T else jnp.pad(x, ((0, t_pad - T), (0, 0)))

    itemsize = jnp.dtype(cdt).itemsize

    # --- fused QKV projection (tiled over rows and output columns) -----------------
    block_n = _pick_block_n(d_pad)
    proj_cost = pl.CostEstimate(
        flops=2 * t_pad * d_in * 3 * d_pad,
        transcendentals=0,
        bytes_accessed=(t_pad * d_in * x.dtype.itemsize
                        + d_in * 3 * d_pad * itemsize
                        + t_pad * 3 * d_pad * itemsize),
    )
    qkv = pl.pallas_call(
        _qkv_proj_kernel,
        out_shape=jax.ShapeDtypeStruct((t_pad, 3 * d_pad), cdt),
        grid=(t_pad // bq, (3 * d_pad) // block_n),
        in_specs=[
            pl.BlockSpec((bq, d_in), lambda i, j: (i, 0)),
            pl.BlockSpec((d_in, block_n), lambda i, j: (0, j)),
        ],
        out_specs=pl.BlockSpec((bq, block_n), lambda i, j: (i, j)),
        compiler_params=pltpu.CompilerParams(
            dimension_semantics=("parallel", "parallel")),
        cost_estimate=proj_cost,
    )(x_p, w_qkv)

    # --- flash attention: Q/K/V are column slabs 0/1/2 of the same qkv array --------
    n_q_tiles = t_pad // bq
    attn_cost = pl.CostEstimate(
        flops=4 * t_pad * t_pad * d_pad,
        transcendentals=t_pad * t_pad,
        bytes_accessed=((1 + 2 * n_q_tiles) * t_pad * d_pad * itemsize
                        + t_pad * d_pad * jnp.dtype(out_dtype).itemsize),
    )
    kernel = functools.partial(
        _flash_attn_kernel, seq_len=T, seq_pad=t_pad, scale=scale
    )
    out_p = pl.pallas_call(
        kernel,
        out_shape=jax.ShapeDtypeStruct((t_pad, d_pad), out_dtype),
        grid=(n_q_tiles, t_pad // bkv),
        in_specs=[
            pl.BlockSpec((bq, d_pad), lambda qi, ki: (qi, 0)),    # Q slab
            pl.BlockSpec((bkv, d_pad), lambda qi, ki: (ki, 1)),   # K slab
            pl.BlockSpec((bkv, d_pad), lambda qi, ki: (ki, 2)),   # V slab
        ],
        out_specs=pl.BlockSpec((bq, d_pad), lambda qi, ki: (qi, 0)),
        scratch_shapes=[
            pltpu.VMEM((bq, _STAT_WIDTH), jnp.float32),   # running max m (lane-dense)
            pltpu.VMEM((bq, _STAT_WIDTH), jnp.float32),   # running denom l (lane-dense)
            pltpu.VMEM((bq, d_pad), jnp.float32),         # output accumulator
        ],
        compiler_params=pltpu.CompilerParams(
            dimension_semantics=("parallel", "arbitrary")),
        cost_estimate=attn_cost,
    )(qkv, qkv, qkv)

    return out_p[:T, :d_out]


class SelfAttentionV1:
    """Pallas-TPU port of the PyTorch SelfAttention_v1 module.

    Weight padding to a lane-dense head dim and the [Wq|Wk|Wv] concatenation are done
    once at construction (hoisted out of the per-forward path).
    """

    def __init__(self, w_query, w_key, w_value, *, compute_dtype=jnp.bfloat16,
                 block_q=256, block_kv=256):
        d_in, d_out = w_query.shape
        self.d_out = int(d_out)
        self.block_q = int(block_q)
        self.block_kv = int(block_kv)
        d_pad = _round_up(self.d_out, 128)

        def _pad_w(w):  # zero columns are exact: they contribute nothing to QK^T / P@V
            return jnp.pad(w.astype(compute_dtype), ((0, 0), (0, d_pad - self.d_out)))

        self.w_qkv = jnp.concatenate(
            [_pad_w(w_query), _pad_w(w_key), _pad_w(w_value)], axis=1
        )  # (d_in, 3 * d_pad), compute dtype

    def __call__(self, x):
        return _self_attention_fwd(x, self.w_qkv, d_out=self.d_out,
                                   block_q=self.block_q, block_kv=self.block_kv)


def _reference(x, wq, wk, wv):
    # Pure-JAX reference mirroring the PyTorch forward exactly (f32 throughout).
    keys = x @ wk
    queries = x @ wq
    values = x @ wv
    attn_scores = queries @ keys.T
    attn_weights = jax.nn.softmax(attn_scores / keys.shape[-1] ** 0.5, axis=-1)
    return attn_weights @ values


if __name__ == "__main__":
    # Small shapes consistent with the module: a sequence of token embeddings.
    T, d_in, d_out = 8, 32, 16

    key = jax.random.PRNGKey(0)
    k_x, k_q, k_k, k_v = jax.random.split(key, 4)

    # Zero-mean token embeddings (as in real models) + torch.rand-style uniform weights.
    x = jax.random.uniform(k_x, (T, d_in), dtype=jnp.float32) - 0.5
    w_query = jax.random.uniform(k_q, (d_in, d_out), dtype=jnp.float32)
    w_key = jax.random.uniform(k_k, (d_in, d_out), dtype=jnp.float32)
    w_value = jax.random.uniform(k_v, (d_in, d_out), dtype=jnp.float32)

    ref = _reference(x, w_query, w_key, w_value)

    # Default fast path: bf16 MXU operands, f32 accumulation -> bf16-level tolerance.
    attn = SelfAttentionV1(w_query, w_key, w_value)
    out = jax.block_until_ready(attn(x))
    assert out.shape == (T, d_out) and out.dtype == x.dtype
    err_bf16 = float(jnp.max(jnp.abs(out - ref)))
    assert jnp.allclose(out, ref, atol=5e-2, rtol=5e-2), \
        f"bf16 path mismatch vs reference (max abs err {err_bf16})"

    # f32 compute path: validates the algorithm (online softmax, masking, exact recip).
    attn_f32 = SelfAttentionV1(w_query, w_key, w_value, compute_dtype=jnp.float32)
    out_f32 = jax.block_until_ready(attn_f32(x))
    err_f32 = float(jnp.max(jnp.abs(out_f32 - ref)))
    assert jnp.allclose(out_f32, ref, atol=1e-4, rtol=1e-4), \
        f"f32 path mismatch vs reference (max abs err {err_f32})"

    print("KERNEL_OK")
</pallas_src>

<mosaic_0001>
module attributes {stable_mosaic.version = 11 : i64} {
  func.func @_qkv_proj_kernel(%arg0: i32, %arg1: i32, %arg2: memref<8x32xf32, #tpu.memory_space<vmem>>, %arg3: memref<32x128xbf16, #tpu.memory_space<vmem>>, %arg4: memref<8x128xbf16, #tpu.memory_space<vmem>>) attributes {dimension_semantics = [#tpu.dimension_semantics<parallel>, #tpu.dimension_semantics<parallel>], iteration_bounds = array<i64: 1, 3>, scalar_prefetch = 0 : i64, scratch_operands = 0 : i64, tpu.core_type = #tpu.core_type<tc>, window_params = [{transform_indices = @transform_0, window_bounds = array<i64: 8, 32>}, {transform_indices = @transform_1, window_bounds = array<i64: 32, 128>}, {transform_indices = @transform_2, window_bounds = array<i64: 8, 128>}]} {
    %c0 = arith.constant 0 : index
    %c0_0 = arith.constant 0 : index
    %0 = vector.load %arg2[%c0, %c0_0] : memref<8x32xf32, #tpu.memory_space<vmem>>, vector<8x32xf32>
    %1 = arith.truncf %0 : vector<8x32xf32> to vector<8x32xbf16>
    %c0_1 = arith.constant 0 : index
    %c0_2 = arith.constant 0 : index
    %2 = vector.load %arg3[%c0_1, %c0_2] : memref<32x128xbf16, #tpu.memory_space<vmem>>, vector<32x128xbf16>
    %cst = arith.constant dense<0.000000e+00> : vector<8x128xf32>
    %3 = tpu.matmul %1, %2, %cst {dimension_numbers = #tpu.dot_dimension_numbers<[1], [0], [0], [1], [0, 0, 1, 1], [], []>} : vector<8x32xbf16>, vector<32x128xbf16>, vector<8x128xf32> -> vector<8x128xf32>
    %4 = arith.truncf %3 : vector<8x128xf32> to vector<8x128xbf16>
    %c0_3 = arith.constant 0 : index
    %c0_4 = arith.constant 0 : index
    %5 = vector.load %arg4[%c0_3, %c0_4] : memref<8x128xbf16, #tpu.memory_space<vmem>>, vector<8x128xbf16>
    tpu.vector_store %arg4[%c0_3, %c0_4], %4 {strides = array<i32>} : memref<8x128xbf16, #tpu.memory_space<vmem>>, vector<8x128xbf16>,
    return
  }
  func.func @transform_0(%arg0: i32, %arg1: i32) -> (i32, i32) {
    %c0_i32 = arith.constant 0 : i32
    %c0_i32_0 = arith.constant 0 : i32
    return %arg0, %c0_i32 : i32, i32
  }
  func.func @transform_1(%arg0: i32, %arg1: i32) -> (i32, i32) {
    %c0_i32 = arith.constant 0 : i32
    %c0_i32_0 = arith.constant 0 : i32
    return %c0_i32, %arg1 : i32, i32
  }
  func.func @transform_2(%arg0: i32, %arg1: i32) -> (i32, i32) {
    %c0_i32 = arith.constant 0 : i32
    return %arg0, %arg1 : i32, i32
  }
}

module attributes {stable_mosaic.version = 11 : i64} {
  func.func @_flash_attn_kernel(%arg0: i32, %arg1: i32, %arg2: memref<8x128xbf16, #tpu.memory_space<vmem>>, %arg3: memref<8x128xbf16, #tpu.memory_space<vmem>>, %arg4: memref<8x128xbf16, #tpu.memory_space<vmem>>, %arg5: memref<8x128xf32, #tpu.memory_space<vmem>>, %arg6: memref<8x128xf32, #tpu.memory_space<vmem>>, %arg7: memref<8x128xf32, #tpu.memory_space<vmem>>, %arg8: memref<8x128xf32, #tpu.memory_space<vmem>>) attributes {dimension_semantics = [#tpu.dimension_semantics<parallel>, #tpu.dimension_semantics<arbitrary>], iteration_bounds = array<i64: 1, 1>, scalar_prefetch = 0 : i64, scratch_operands = 3 : i64, tpu.core_type = #tpu.core_type<tc>, window_params = [{transform_indices = @transform_0, window_bounds = array<i64: 8, 128>}, {transform_indices = @transform_1, window_bounds = array<i64: 8, 128>}, {transform_indices = @transform_2, window_bounds = array<i64: 8, 128>}, {transform_indices = @transform_3, window_bounds = array<i64: 8, 128>}]} {
    %c0_i32 = arith.constant 0 : i32
    %0 = arith.cmpi eq, %arg1, %c0_i32 : i32
    %1 = arith.extui %0 : i1 to i32
    %c0_i32_0 = arith.constant 0 : i32
    %2 = arith.cmpi ne, %1, %c0_i32_0 : i32
    scf.if %2 {
      %cst_24 = arith.constant -1.000000e+30 : f32
      %39 = vector.broadcast %cst_24 : f32 to vector<8x128xf32>
      %c0_25 = arith.constant 0 : index
      %c0_26 = arith.constant 0 : index
      %40 = vector.load %arg6[%c0_25, %c0_26] : memref<8x128xf32, #tpu.memory_space<vmem>>, vector<8x128xf32>
      tpu.vector_store %arg6[%c0_25, %c0_26], %39 {strides = array<i32>} : memref<8x128xf32, #tpu.memory_space<vmem>>, vector<8x128xf32>,
      %cst_27 = arith.constant 0.000000e+00 : f32
      %41 = vector.broadcast %cst_27 : f32 to vector<8x128xf32>
      %c0_28 = arith.constant 0 : index
      %c0_29 = arith.constant 0 : index
      %42 = vector.load %arg7[%c0_28, %c0_29] : memref<8x128xf32, #tpu.memory_space<vmem>>, vector<8x128xf32>
      tpu.vector_store %arg7[%c0_28, %c0_29], %41 {strides = array<i32>} : memref<8x128xf32, #tpu.memory_space<vmem>>, vector<8x128xf32>,
      %cst_30 = arith.constant 0.000000e+00 : f32
      %43 = vector.broadcast %cst_30 : f32 to vector<8x128xf32>
      %c0_31 = arith.constant 0 : index
      %c0_32 = arith.constant 0 : index
      %44 = vector.load %arg8[%c0_31, %c0_32] : memref<8x128xf32, #tpu.memory_space<vmem>>, vector<8x128xf32>
      tpu.vector_store %arg8[%c0_31, %c0_32], %43 {strides = array<i32>} : memref<8x128xf32, #tpu.memory_space<vmem>>, vector<8x128xf32>,
    } else {
    }
    %c0 = arith.constant 0 : index
    %c0_1 = arith.constant 0 : index
    %3 = vector.load %arg2[%c0, %c0_1] : memref<8x128xbf16, #tpu.memory_space<vmem>>, vector<8x128xbf16>
    %cst = arith.constant 2.500000e-01 : bf16
    %4 = vector.broadcast %cst : bf16 to vector<8x128xbf16>
    %5 = arith.mulf %3, %4 : vector<8x128xbf16>
    %c0_2 = arith.constant 0 : index
    %c0_3 = arith.constant 0 : index
    %6 = vector.load %arg3[%c0_2, %c0_3] : memref<8x128xbf16, #tpu.memory_space<vmem>>, vector<8x128xbf16>
    %cst_4 = arith.constant dense<0.000000e+00> : vector<8x8xf32>
    %7 = tpu.matmul %5, %6, %cst_4 {dimension_numbers = #tpu.dot_dimension_numbers<[1], [1], [0], [0], [0, 0, 1, 0], [], []>} : vector<8x128xbf16>, vector<8x128xbf16>, vector<8x8xf32> -> vector<8x8xf32>
    %c0_5 = arith.constant 0 : index
    %c0_6 = arith.constant 0 : index
    %8 = vector.load %arg6[%c0_5, %c0_6] : memref<8x128xf32, #tpu.memory_space<vmem>>, vector<8x1xf32>
    %c0_7 = arith.constant 0 : index
    %c0_8 = arith.constant 0 : index
    %9 = vector.load %arg7[%c0_7, %c0_8] : memref<8x128xf32, #tpu.memory_space<vmem>>, vector<8x1xf32>
    %cst_9 = arith.constant dense<0xFF800000> : vector<8xf32>
    %10 = vector.multi_reduction <maximumf>, %7, %cst_9 [1] : vector<8x8xf32> to vector<8xf32>
    %11 = vector.shape_cast %10 : vector<8xf32> to vector<8x1xf32>
    %12 = arith.maximumf %8, %11 : vector<8x1xf32>
    %13 = arith.subf %8, %12 : vector<8x1xf32>
    %14 = math.exp %13 : vector<8x1xf32>
    %15 = vector.broadcast %12 : vector<8x1xf32> to vector<8x8xf32>
    %16 = arith.subf %7, %15 : vector<8x8xf32>
    %17 = math.exp %16 : vector<8x8xf32>
    %18 = arith.mulf %14, %9 : vector<8x1xf32>
    %cst_10 = arith.constant dense<0.000000e+00> : vector<8xf32>
    %19 = vector.multi_reduction <add>, %17, %cst_10 [1] : vector<8x8xf32> to vector<8xf32>
    %20 = vector.shape_cast %19 : vector<8xf32> to vector<8x1xf32>
    %21 = arith.addf %18, %20 : vector<8x1xf32>
    %c0_11 = arith.constant 0 : index
    %c0_12 = arith.constant 0 : index
    %22 = vector.load %arg8[%c0_11, %c0_12] : memref<8x128xf32, #tpu.memory_space<vmem>>, vector<8x128xf32>
    %23 = vector.broadcast %14 : vector<8x1xf32> to vector<8x128xf32>
    %24 = arith.mulf %23, %22 : vector<8x128xf32>
    %25 = arith.truncf %17 : vector<8x8xf32> to vector<8x8xbf16>
    %c0_13 = arith.constant 0 : index
    %c0_14 = arith.constant 0 : index
    %26 = vector.load %arg4[%c0_13, %c0_14] : memref<8x128xbf16, #tpu.memory_space<vmem>>, vector<8x128xbf16>
    %cst_15 = arith.constant dense<0.000000e+00> : vector<8x128xf32>
    %27 = tpu.matmul %25, %26, %cst_15 {dimension_numbers = #tpu.dot_dimension_numbers<[1], [0], [0], [1], [0, 0, 1, 1], [], []>} : vector<8x8xbf16>, vector<8x128xbf16>, vector<8x128xf32> -> vector<8x128xf32>
    %28 = arith.addf %24, %27 : vector<8x128xf32>
    %c0_16 = arith.constant 0 : index
    %c0_17 = arith.constant 0 : index
    %29 = vector.load %arg8[%c0_16, %c0_17] : memref<8x128xf32, #tpu.memory_space<vmem>>, vector<8x128xf32>
    tpu.vector_store %arg8[%c0_16, %c0_17], %28 {strides = array<i32>} : memref<8x128xf32, #tpu.memory_space<vmem>>, vector<8x128xf32>,
    %30 = vector.shape_cast %12 : vector<8x1xf32> to vector<8x1xf32>
    %31 = vector.broadcast %30 : vector<8x1xf32> to vector<8x128xf32>
    %c0_18 = arith.constant 0 : index
    %c0_19 = arith.constant 0 : index
    %32 = vector.load %arg6[%c0_18, %c0_19] : memref<8x128xf32, #tpu.memory_space<vmem>>, vector<8x128xf32>
    tpu.vector_store %arg6[%c0_18, %c0_19], %31 {strides = array<i32>} : memref<8x128xf32, #tpu.memory_space<vmem>>, vector<8x128xf32>,
    %33 = vector.shape_cast %21 : vector<8x1xf32> to vector<8x1xf32>
    %34 = vector.broadcast %33 : vector<8x1xf32> to vector<8x128xf32>
    %c0_20 = arith.constant 0 : index
    %c0_21 = arith.constant 0 : index
    %35 = vector.load %arg7[%c0_20, %c0_21] : memref<8x128xf32, #tpu.memory_space<vmem>>, vector<8x128xf32>
    tpu.vector_store %arg7[%c0_20, %c0_21], %34 {strides = array<i32>} : memref<8x128xf32, #tpu.memory_space<vmem>>, vector<8x128xf32>,
    %c0_i32_22 = arith.constant 0 : i32
    %36 = arith.cmpi eq, %arg1, %c0_i32_22 : i32
    %37 = arith.extui %36 : i1 to i32
    %c0_i32_23 = arith.constant 0 : i32
    %38 = arith.cmpi ne, %37, %c0_i32_23 : i32
    scf.if %38 {
      %c0_24 = arith.constant 0 : index
      %c0_25 = arith.constant 0 : index
      %39 = vector.load %arg8[%c0_24, %c0_25] : memref<8x128xf32, #tpu.memory_space<vmem>>, vector<8x128xf32>
      %c0_26 = arith.constant 0 : index
      %c0_27 = arith.constant 0 : index
      %40 = vector.load %arg7[%c0_26, %c0_27] : memref<8x128xf32, #tpu.memory_space<vmem>>, vector<8x1xf32>
      %41 = vector.broadcast %40 : vector<8x1xf32> to vector<8x128xf32>
      %42 = arith.divf %39, %41 : vector<8x128xf32>
      %c0_28 = arith.constant 0 : index
      %c0_29 = arith.constant 0 : index
      %43 = vector.load %arg5[%c0_28, %c0_29] : memref<8x128xf32, #tpu.memory_space<vmem>>, vector<8x128xf32>
      tpu.vector_store %arg5[%c0_28, %c0_29], %42 {strides = array<i32>} : memref<8x128xf32, #tpu.memory_space<vmem>>, vector<8x128xf32>,
    } else {
    }
    return
  }
  func.func @transform_0(%arg0: i32, %arg1: i32) -> (i32, i32) {
    %c0_i32 = arith.constant 0 : i32
    %c0_i32_0 = arith.constant 0 : i32
    return %arg0, %c0_i32 : i32, i32
  }
  func.func @transform_1(%arg0: i32, %arg1: i32) -> (i32, i32) {
    %c1_i32 = arith.constant 1 : i32
    %c0_i32 = arith.constant 0 : i32
    return %arg1, %c1_i32 : i32, i32
  }
  func.func @transform_2(%arg0: i32, %arg1: i32) -> (i32, i32) {
    %c2_i32 = arith.constant 2 : i32
    %c0_i32 = arith.constant 0 : i32
    return %arg1, %c2_i32 : i32, i32
  }
  func.func @transform_3(%arg0: i32, %arg1: i32) -> (i32, i32) {
    %c0_i32 = arith.constant 0 : i32
    %c0_i32_0 = arith.constant 0 : i32
    return %arg0, %c0_i32 : i32, i32
  }
}

</mosaic_0001>

<bundles_post_ra>
// kernel: _self_attention_fwd.2
= control target key start
LH: loop header
LB: loop body
LE: loop exit
PB: predicated region body
PF: predicated region fallthrough
CT: control target
= control target key end

     0   :  { %7 = vsyncpa [#allocation3], 0  ;;  %s695_s0 = inlined_call_operand.hbm [shape: f32[8,32], index: 0, kind: input, shape index: {}]   ;;  %s696_s1 = inlined_call_operand.hbm [shape: bf16[32,384], index: 1, kind: input, shape index: {}]   ;;  %s697_s2 = inlined_call_operand.vmem [shape: bf16[8,384], index: 2, kind: output, shape index: {}]  }
   0x1   :  { %8 = vsyncpa [#allocation5], 0 }
   0x2   :  { %10 = vsyncpa [#allocation5 + $0x1], 0  ;;  %s576_s9 = smov 0   ;;  %s578_s10 = smov 0  }
   0x3   :  { %s580_s11 = smov 0   ;;  %s582_s12 = smov 0  }
   0x4   :  { %s584_s13 = smov 0   ;;  %s586_s14 = smov 0  }
   0x5 LB: > { %s348_s15 = sadd.s32 4294967295, %s555_s14   ;;  %s61_s16 = sadd.s32 1, %s543_s11  ;;  %s555_s14 = sphi %s586_s14, %s16_s14   ;;  %s551_s13 = sphi %s584_s13, %s707_s13   ;;  %s547_s12 = sphi %s582_s12, %s706_s12   ;;  %s543_s11 = sphi %s580_s11, %s705_s11   ;;  %s539_s10 = sphi %s578_s10, %s704_s10   ;;  %s535_s9 = sphi %s576_s9, %s703_s9  }
   0x6   : > { %p68_p0 = scmp.ne.s32.totalorder %s543_s11, %s539_s10  ;;  %p69_p1 = scmp.eq.s32.totalorder %s555_s14, 0 }
   0x7   : > { %p74_p2 = scmp.ne.s32.totalorder %s539_s10, %s535_s9  ;;  %p610_p3 = scmp.eq.s32.totalorder %s348_s15, 0 }
   0x8   : > { %p614_p4 = por %p69_p1, %p68_p0  ;;  %p350_p5 = scmp.ge.s32.totalorder %s555_s14, 1 }
   0x9   : > { %p621_p6 = por %p610_p3, %p74_p2  ;;  %p113_p7 = scmp.lt.s32.totalorder %s555_s14, 4 }
   0xa   : > { %s127_s22 = sshll.u32 %s695_s0, 4  ;;  %s557_s24 = smov [#allocation2]   ;;  %s128_s22 = int_to_ptr.hbm [resolvable:$true] %s127_s22 }
   0xb   : > { %p629_p8 = pnand %p350_p5, %p113_p7  ;;  %s129_s25 = sshll.u32 %s557_s24, 4  ;;  %s130_s25 = int_to_ptr.vmem [resolvable:$true] %s129_s25 }
   0xc   : > { %p387_p10 = scmp.lt.s32.totalorder %s555_s14, 3  ;;  %s25_s27 = sadd.s32 1, %s551_s13 }
   0xd   : > { %p378_p9 = pneg %p629_p8  ;;  %p26_p13 = scmp.ge.s32.totalorder %s25_s27, 3 }
   0xe   : > { %p640_p12 = pnand %p387_p10, %p614_p4  ;;  %s140_s28 = sand.u32 1, %s543_s11  }
   0xf   : > { %p379_p11 = pnand %p378_p9, %p610_p3  ;;  %s354_s29 = sshll.u32 %s551_s13, 2 }
  0x10   : > { %s709_s27 = smov (%p26_p13, %s25_s27), 0  ;;  %s353_s30 = sshll.u32 %s140_s28, 4 }
  0x11   : > { %381 = dma.hbm_to_vmem [thread:$0]  (!%p379_p11), %s128_s22, 128, %s130_s25, [#allocation3]  }
  0x12   : > { %s58_s3 = ssub.s32 %s551_s13, %s709_s27  ;;  %s148_s6 = scalar_lea.hbm %s696_s1, %s354_s29 }
  0x13   : > { %p59_p0 = scmp.eq.s32.totalorder %s58_s3, 0  ;;  %s149_s7 = sshll.u32 %s148_s6, 4  ;;  %s150_s7 = int_to_ptr.hbm [resolvable:$true] %s149_s7 }
  0x14   : > { %s144_s8 = scalar_lea.vmem [#allocation4], %s353_s30  ;;  %s141_s18 = scalar_lea.sflag [#allocation5], %s140_s28 }
  0x15   : > { %s151_s9 = sshll.u32 %s144_s8, 4  ;;  %s558_s20 = smov 192   ;;  %s152_s9 = int_to_ptr.vmem [resolvable:$true] %s151_s9 }
  0x16   : > { %s657_s15 = scalar_select %p59_p0, %s543_s11, %s61_s16  }
  0x17   : > { %s559_s21 = smov 64   ;;  %s560_s22 = smov 4  }
  0x18   : > { %385 = dma.hbm_to_vmem [thread:$0]  (!%p640_p12), %s150_s7, 256, %s152_s9, %s141_s18, %s558_s20, %s559_s21, %s560_s22  }
  0x19   : > { %163 = sbr.rel (%p629_p8) target bundleno = 177 (0xb1), region = 28 }
  0x1e   : > { %526 = dma.done.wait (%p610_p3), [#allocation3], 128  }
  0x1f   : > { %528 = vsyncadd (%p610_p3), [#allocation3], 4294967168  ;;  %s170_s16 = sand.u32 1, %s539_s10  }
  0x20   : > { %s357_s24 = sshll.u32 %s170_s16, 4  ;;  %s171_s25 = scalar_lea.sflag [#allocation5], %s170_s16 }
  0x21   : > { %s174_s28 = scalar_lea.vmem [#allocation4], %s357_s24 }
  0x22   : > { %530 = dma.done.wait (%p621_p6), %s171_s25, 256  }
  0x23   : > { %532 = vsyncadd (%p621_p6), %s171_s25, 4294967040  ;;  %v371_v0 = vld [vmem:[%s174_s28 + $0x8] sm:$0xff]  ;;  %v370_v1 = vld [vmem:[%s174_s28] sm:$0xff]  ;;  %vm226_vm0 = vcmask 261120   ;;  %p201_p1 = scmp.lt.s32.totalorder %s547_s12, 2 }
  0x24   : > { %236 = vmatpush.bf16.msra.mxu0 %v371_v0  ;;  %v208_v2 = vld [vmem:[#allocation2] sm:$0xff] }
  0x25   : > { %v209_v3 = vpack.c.bf16 %v208_v2, %v208_v2  ;;  %s711_s12 = smov (!%p201_p1, %s547_s12), 2 }
  0x26   : > { %s358_s17 = sshll.u32 %s711_s12, 2 }
  0x27   : > { %s206_s29 = scalar_lea.vmem %s697_s2, %s358_s17 }
  0x28   : > { %237 = vmatpush.bf16.msra.mxu0 %v370_v1 }
  0x2b   : > { %367 = vmatmul.msk.bf16.vlgmr.msra.gmra.mxu0 %vm226_vm0, %v209_v3 }
  0xa8   : > { %v239_v4 = vpop.f32.mrf.mxu0 }
  0xa9   : > { %v243_v5 = vpack.c.bf16 %v239_v4, %v239_v4 }
  0xab   : > { %244 = vst [vmem:[%s206_s29] sm:$0xf] %v243_v5 }
  0xb0   : > { %v241_v6 = vpop.f32.mrf.mxu0 }
  0xb1 PF: > { %s16_s14 = sadd.s32 1, %s555_s14   ;;  %s703_s9 = smov %s539_s10 }
  0xb2   : > { %p13_p2 = scmp.ge.s32.totalorder %s16_s14, 5   ;;  %s704_s10 = smov %s543_s11 }
  0xb3   : > { %s705_s11 = smov %s657_s15  ;;  %s706_s12 = smov %s551_s13 }
  0xb4   : > { %s707_s13 = smov %s709_s27  ;;  %15 = sbr.rel (!%p13_p2) target bundleno = 5 (0x5), region = 74 }
  0xb9   :  { %272 = vsyncpa [#allocation3], 1 }
  0xba   :  { %274 = vsyncpa [#allocation3 + $0x1], 1 }
  0xbb   :  { %275 = vsyncpa [#allocation5], 1 }
  0xbc   :  { %277 = vsyncpa [#allocation5 + $0x1], 1 }

// kernel: _self_attention_fwd.3
= control target key start
LH: loop header
LB: loop body
LE: loop exit
PB: predicated region body
PF: predicated region fallthrough
CT: control target
= control target key end

     0   :  { %s227_s0 = inlined_call_operand.vmem [shape: bf16[8,384], index: 0, kind: input, shape index: {}, may-alias: {0,1,2}]   ;;  %s228_s1 = inlined_call_operand.vmem [shape: bf16[8,384], index: 1, kind: input, shape index: {}, may-alias: {0,1,2}]   ;;  %s229_s2 = inlined_call_operand.vmem [shape: bf16[8,384], index: 2, kind: input, shape index: {}, may-alias: {0,1,2}]   ;;  %s230_s3 = inlined_call_operand.hbm [shape: f32[8,128], index: 3, kind: output, shape index: {}]  }
   0x1   :  { %v150_v0 = vld [vmem:[%s228_s1 + $0x4] sm:$0xf]  ;;  %v29_v1 = vld [vmem:[%s227_s0] sm:$0xf] }
   0x2   :  { %8 = vsyncpa [#allocation6], 0  ;;  %41 = vmatpush.bf16.xpose.msra.mxu0 %v150_v0  ;;  %v30_v2 = vunpack.c.l.bf16 %v29_v1  ;;  %vm49_vm0 = vcmask 64512   ;;  %v190_v8 = vmov 0   ;;  %v151_v11 = vld [vmem:[%s229_s2 + $0x8] sm:$0xf] }
   0x3   :  { %155 = vset.pattern.permute.xlu0 %v190_v8  ;;  %156 = vset.pattern.permute.xlu1 %v190_v8  ;;  %vm82_vm1 = vcmask 1043456   ;;  %s191_s2 = smov [#allocation5]   ;;  %s141_s19 = sshll.u32 %s230_s3, 4  ;;  %s142_s19 = int_to_ptr.hbm [resolvable:$true] %s141_s19 }
   0x4   :  { %v31_v3 = vmul.f32 0.25, %v30_v2  ;;  %157 = vset.pattern.permute.xlu2 %v190_v8  ;;  %v84_v12 = vsel %vm82_vm1, %v151_v11, 0  ;;  %s139_s16 = sshll.u32 %s191_s2, 4  ;;  %s140_s16 = int_to_ptr.vmem [resolvable:$true] %s139_s16 }
   0x5   :  { %93 = vmatpush.bf16.msra.mxu1 %v84_v12 }
   0x6   :  { %v32_v4 = vpack.c.bf16 %v31_v3, %v31_v3 }
   0x9   :  { %42 = vmatmul.bf16.vlgmr.msra.gmra.mxu0 %v32_v4 }
  0x86   :  { %v43_v5 = vpop.f32.mrf.mxu0 }
  0x87   :  { %v50_v6 = vsel %vm49_vm0, %v43_v5, -inf }
  0x88   :  { %51 = vmax.xlane.f32.xlu0 %v50_v6 }
  0x8e   :  { %v45_v7 = vpop.f32.mrf.mxu0 }
  0xfb   :  { %v52_v9 = vpop.xlane.xlu0 %51 }
  0xfc   :  { %v53_v10 = vmax.f32 %v52_v9, -1e+30 }
  0xfe   :  { %59 = vperm.xlu0 %155, %v53_v10   ;;  %v54_v19 = vsub.f32 -1e+30, %v53_v10 }
 0x100   :  { %v55_v20 = vmul.f32 1.442695, %v54_v19 }
 0x170   :  { %v60_v13 = vpop.permute.xlu0 %59 }
 0x171   :  { %v62_v14 = vsub.f32 %v43_v5, %v60_v13 }
 0x173   :  { %v63_v15 = vmul.f32 1.442695, %v62_v14 }
 0x175   :  { %158 = vpow2.f32 %v63_v15 }
 0x176   :  { %160 = vpow2.f32 %v55_v20 }
 0x17b   :  { %v159_v16 = vpop.eup %158 }
 0x17c   :  { %v66_v17 = vsel %vm49_vm0, %v159_v16, 0.0  ;;  %v77_v18 = vpack.c.bf16 %v159_v16, %v159_v16  ;;  %v161_v21 = vpop.eup %160 }
 0x17d   :  { %67 = vadd.xlane.f32.xlu1 %v66_v17  ;;  %v65_v22 = vmul.f32 0.0, %v161_v21 }
 0x17e   :  { %152 = vmatmul.msk.bf16.vlgmr.msra.gmra.mxu1 %vm49_vm0, %v77_v18 }
 0x1f0   :  { %v68_v23 = vpop.xlane.xlu1 %67 }
 0x1f1   :  { %v69_v24 = vadd.f32 %v68_v23, %v65_v22 }
 0x1f3   :  { %104 = vperm.xlu1 %156, %v69_v24  }
 0x1fb   :  { %v95_v25 = vpop.f32.mrf.mxu1 }
 0x203   :  { %v97_v26 = vpop.f32.mrf.mxu1 }
 0x265   :  { %v105_v27 = vpop.permute.xlu1 %104 }
 0x266   :  { %115 = vperm.xlu2 %157, %v105_v27  }
 0x26e   :  { %73 = vperm.xlu2 %157, %v161_v21  }
 0x2c0   :  { %v116_v28 = vpop.permute.xlu2 %115 }
 0x2c1   :  { %162 = vrcp.f32 %v116_v28  ;;  %v129_v33 = vand.u32 2147483648, %v116_v28  ;;  %v127_v35 = vand.u32 2147483647, %v116_v28  ;;  %vm123_vm3 = vweird.f32 %v116_v28 }
 0x2c3   :  { %v130_v38 = vor.u32 1.1754944e-38, %v129_v33  ;;  %vm128_vm5 = vcmp.eq.f32.partialorder %v127_v35, 8.507059e+37 }
 0x2c7   :  { %v163_v29 = vpop.eup %162 }
 0x2c8   :  { %v119_v30 = vmul.f32 %v163_v29, %v116_v28  ;;  %v74_v31 = vpop.permute.xlu2 %73  ;;  %vm124_vm2 = vweird.f32 %v163_v29 }
 0x2c9   :  { %v76_v36 = vmul.f32 0.0, %v74_v31  ;;  %vm125_vm4 = vmor %vm123_vm3, %vm124_vm2 }
 0x2ca   :  { %v120_v32 = vsub.f32 1.0, %v119_v30 }
 0x2cb   :  { %v99_v40 = vadd.f32 %v95_v25, %v76_v36 }
 0x2cc   :  { %v121_v34 = vmul.f32 %v163_v29, %v120_v32 }
 0x2ce   :  { %v122_v37 = vadd.f32 %v163_v29, %v121_v34 }
 0x2d0   :  { %v126_v39 = vsel %vm125_vm4, %v163_v29, %v122_v37 }
 0x2d1   :  { %v131_v41 = vsel %vm128_vm5, %v130_v38, %v126_v39 }
 0x2d2   :  { %v132_v42 = vmul.f32 %v131_v41, %v99_v40 }
 0x2d4   :  { %133 = vst [vmem:[#allocation5] sm:$0xff] %v132_v42 }
 0x2d5   :  { %144 = dma.vmem_to_hbm [thread:$0]  %s140_s16, 128, %s142_s19, [#allocation6]  }
 0x2d6   :  { %188 = dma.done.wait [#allocation6], 128  }
 0x2d7   :  { %189 = vsyncadd [#allocation6], 4294967168 }
 0x2d8   :  { %149 = vsyncpa [#allocation6], 1 }

</bundles_post_ra>
